<compile_context>
chip_gen: v5e
topology: v5e:2x2
jax: 0.10.0
libtpu: 0.0.40
codegen_flags: <defaults>
</compile_context>

<pallas_src>
import functools

import jax
import jax.numpy as jnp
from jax.experimental import pallas as pl
from jax.experimental.pallas import tpu as pltpu


def _ce_kernel(pred_ref, labels_ref, out_ref, *, tile_n, n_rows):
    # pred_ref  : (TILE_N, C) logits (native dtype) in VMEM
    # labels_ref: (TILE_N, 1) int32 binned labels in VMEM
    # out_ref   : (1, 8, 128) f32 lane-dense partial-sum block
    i = pl.program_id(0)

    pred = pred_ref[...].astype(jnp.float32)                     # (TILE_N, C)
    labels = labels_ref[...]                                     # (TILE_N, 1)

    # Numerically-stable log-softmax, everything expressed via `shifted`.
    row_max = jnp.max(pred, axis=1, keepdims=True)               # (TILE_N, 1)
    shifted = pred - row_max                                     # (TILE_N, C)
    lse = jnp.log(jnp.sum(jnp.exp(shifted), axis=1, keepdims=True))

    # One-hot select of the true-class (shifted) logit; no gather on TPU.
    class_ids = jax.lax.broadcasted_iota(jnp.int32, shifted.shape, 1)
    label_shifted = jnp.sum(
        jnp.where(class_ids == labels, shifted, 0.0), axis=1, keepdims=True
    )

    per_row_loss = lse - label_shifted                           # (TILE_N, 1)

    # Mask padded rows of the last tile out of the partial sum.
    row_ids = jax.lax.broadcasted_iota(jnp.int32, (tile_n, 1), 0)
    valid = (i * tile_n + row_ids) < n_rows
    tile_sum = jnp.sum(jnp.where(valid, per_row_loss, 0.0))

    out_ref[...] = jnp.full(out_ref.shape, tile_sum, dtype=jnp.float32)


def ce_loss(pred, target, value_range, tile_n=None):
    """pred: (N, C) float logits; target: (N,) integers in [0, value_range)."""
    n, c = pred.shape
    bin_size = value_range // c
    itemsize = jnp.dtype(pred.dtype).itemsize

    # Bin the targets on the host side (tiny) and clamp so a non-divisible
    # `value_range` cannot produce an out-of-range class id.
    labels = jnp.clip(target.astype(jnp.int32) // bin_size, 0, c - 1)
    labels = labels.reshape(n, 1)

    # Tile sizing: keep each double-buffered pred tile comfortably inside the
    # scoped VMEM budget on every generation (<= ~4 MiB per buffer).
    if tile_n is None:
        per_buffer_budget = 4 * 1024 * 1024
        tile_n = max(8, min(512, (per_buffer_budget // (c * itemsize)) // 8 * 8))
        tile_n = min(tile_n, ((n + 7) // 8) * 8)   # don't over-pad tiny N
    tile_n = max(8, (tile_n // 8) * 8)

    num_tiles = pl.cdiv(n, tile_n)
    n_pad = num_tiles * tile_n
    if n_pad != n:
        pred = jnp.pad(pred, ((0, n_pad - n), (0, 0)))
        labels = jnp.pad(labels, ((0, n_pad - n), (0, 0)))

    kernel = functools.partial(_ce_kernel, tile_n=tile_n, n_rows=n)

    cost = pl.CostEstimate(
        flops=5 * n * c,
        transcendentals=n * c,
        bytes_accessed=n * c * itemsize + n * 4 + num_tiles * 8 * 128 * 4,
    )

    partial_sums = pl.pallas_call(
        kernel,
        out_shape=jax.ShapeDtypeStruct((num_tiles, 8, 128), jnp.float32),
        grid_spec=pltpu.PrefetchScalarGridSpec(
            num_scalar_prefetch=0,
            grid=(num_tiles,),
            in_specs=[
                pl.BlockSpec((tile_n, c), lambda i: (i, 0)),   # pred tile
                pl.BlockSpec((tile_n, 1), lambda i: (i, 0)),   # label tile
            ],
            out_specs=pl.BlockSpec((1, 8, 128), lambda i: (i, 0, 0)),
        ),
        compiler_params=pltpu.CompilerParams(
            dimension_semantics=("parallel",),
            vmem_limit_bytes=32 * 1024 * 1024,
        ),
        cost_estimate=cost,
    )(pred, labels)

    # Final mean over per-tile partial sums (num_tiles scalars) in plain JAX.
    return jnp.sum(partial_sums[:, 0, 0]) / jnp.float32(n)

    # TODO(synk): for very large vocab C, add a second grid axis over C with an
    # online (flash-style) logsumexp; not needed at these class counts.


class CELossPallas:
    def __init__(self, value_range):
        self._range = value_range

    def __call__(self, pred, target, tile_n=None):
        return ce_loss(pred, target, self._range, tile_n=tile_n)


def _reference(pred, target, value_range):
    c = pred.shape[1]
    bin_size = value_range // c
    labels = target.astype(jnp.int32) // bin_size
    logp = jax.nn.log_softmax(pred.astype(jnp.float32), axis=1)
    nll = -jnp.take_along_axis(logp, labels[:, None], axis=1)[:, 0]
    return jnp.mean(nll)


if __name__ == "__main__":
    key = jax.random.PRNGKey(0)
    k_pred, k_tgt = jax.random.split(key)

    # Small but multi-tile: N=200 with tile_n=64 -> 4 row tiles, last one padded.
    N, C, VALUE_RANGE = 200, 8, 64
    pred = jax.random.normal(k_pred, (N, C), dtype=jnp.float32)
    target = jax.random.randint(k_tgt, (N,), 0, VALUE_RANGE, dtype=jnp.int32)

    loss_mod = CELossPallas(VALUE_RANGE)
    loss = jax.block_until_ready(loss_mod(pred, target, tile_n=64))
    ref = _reference(pred, target, VALUE_RANGE)
    assert jnp.allclose(loss, ref, atol=1e-5, rtol=1e-5), (loss, ref)

    # Also check the auto-tiled single-tile path (native dtype preserved).
    loss2 = jax.block_until_ready(loss_mod(pred, target))
    assert jnp.allclose(loss2, ref, atol=1e-5, rtol=1e-5), (loss2, ref)

    print("KERNEL_OK")
</pallas_src>

<mosaic_0001>
module attributes {stable_mosaic.version = 11 : i64} {
  func.func @_ce_kernel(%arg0: i32, %arg1: memref<64x8xf32, #tpu.memory_space<vmem>>, %arg2: memref<64x1xi32, #tpu.memory_space<vmem>>, %arg3: memref<1x8x128xf32, #tpu.memory_space<vmem>>) attributes {dimension_semantics = [#tpu.dimension_semantics<parallel>], iteration_bounds = array<i64: 4>, scalar_prefetch = 0 : i64, scratch_operands = 0 : i64, tpu.core_type = #tpu.core_type<tc>, window_params = [{transform_indices = @transform_0, window_bounds = array<i64: 64, 8>}, {transform_indices = @transform_1, window_bounds = array<i64: 64, 1>}, {transform_indices = @transform_2, window_bounds = array<i64: 1, 8, 128>}]} {
    %c0 = arith.constant 0 : index
    %c0_0 = arith.constant 0 : index
    %0 = vector.load %arg1[%c0, %c0_0] : memref<64x8xf32, #tpu.memory_space<vmem>>, vector<64x8xf32>
    %c0_1 = arith.constant 0 : index
    %c0_2 = arith.constant 0 : index
    %1 = vector.load %arg2[%c0_1, %c0_2] : memref<64x1xi32, #tpu.memory_space<vmem>>, vector<64x1xi32>
    %cst = arith.constant dense<0xFF800000> : vector<64xf32>
    %2 = vector.multi_reduction <maximumf>, %0, %cst [1] : vector<64x8xf32> to vector<64xf32>
    %3 = vector.shape_cast %2 : vector<64xf32> to vector<64x1xf32>
    %4 = vector.broadcast %3 : vector<64x1xf32> to vector<64x8xf32>
    %5 = arith.subf %0, %4 : vector<64x8xf32>
    %6 = math.exp %5 : vector<64x8xf32>
    %cst_3 = arith.constant dense<0.000000e+00> : vector<64xf32>
    %7 = vector.multi_reduction <add>, %6, %cst_3 [1] : vector<64x8xf32> to vector<64xf32>
    %8 = vector.shape_cast %7 : vector<64xf32> to vector<64x1xf32>
    %9 = math.log %8 : vector<64x1xf32>
    %10 = tpu.iota {dimensions = array<i32: 1>} : vector<64x8xi32>
    %11 = vector.broadcast %1 : vector<64x1xi32> to vector<64x8xi32>
    %12 = arith.cmpi eq, %10, %11 : vector<64x8xi32>
    %cst_4 = arith.constant 0.000000e+00 : f32
    %13 = vector.broadcast %cst_4 : f32 to vector<64x8xf32>
    %14 = arith.select %12, %5, %13 : vector<64x8xi1>, vector<64x8xf32>
    %cst_5 = arith.constant dense<0.000000e+00> : vector<64xf32>
    %15 = vector.multi_reduction <add>, %14, %cst_5 [1] : vector<64x8xf32> to vector<64xf32>
    %16 = vector.shape_cast %15 : vector<64xf32> to vector<64x1xf32>
    %17 = arith.subf %9, %16 : vector<64x1xf32>
    %18 = tpu.iota {dimensions = array<i32: 0>} : vector<64x1xi32>
    %c64_i32 = arith.constant 64 : i32
    %19 = arith.muli %arg0, %c64_i32 : i32
    %20 = vector.broadcast %19 : i32 to vector<64x1xi32>
    %21 = arith.addi %20, %18 : vector<64x1xi32>
    %c200_i32 = arith.constant 200 : i32
    %22 = vector.broadcast %c200_i32 : i32 to vector<64x1xi32>
    %23 = arith.cmpi slt, %21, %22 : vector<64x1xi32>
    %cst_6 = arith.constant 0.000000e+00 : f32
    %24 = vector.broadcast %cst_6 : f32 to vector<64x1xf32>
    %25 = arith.select %23, %17, %24 : vector<64x1xi1>, vector<64x1xf32>
    %26 = vector.shape_cast %25 : vector<64x1xf32> to vector<1x64x1xf32>
    %cst_7 = arith.constant dense<0.000000e+00> : vector<1xf32>
    %27 = vector.multi_reduction <add>, %26, %cst_7 [1, 2] : vector<1x64x1xf32> to vector<1xf32>
    %28 = vector.shape_cast %27 : vector<1xf32> to vector<1x1x1xf32>
    %29 = vector.extract %28[0, 0, 0] : f32 from vector<1x1x1xf32>
    %30 = vector.broadcast %29 : f32 to vector<1x8x128xf32>
    %c0_8 = arith.constant 0 : index
    %c0_9 = arith.constant 0 : index
    %c0_10 = arith.constant 0 : index
    %31 = vector.load %arg3[%c0_8, %c0_9, %c0_10] : memref<1x8x128xf32, #tpu.memory_space<vmem>>, vector<1x8x128xf32>
    tpu.vector_store %arg3[%c0_8, %c0_9, %c0_10], %30 {strides = array<i32>} : memref<1x8x128xf32, #tpu.memory_space<vmem>>, vector<1x8x128xf32>,
    return
  }
  func.func @transform_0(%arg0: i32) -> (i32, i32) {
    %c0_i32 = arith.constant 0 : i32
    %c0_i32_0 = arith.constant 0 : i32
    return %arg0, %c0_i32 : i32, i32
  }
  func.func @transform_1(%arg0: i32) -> (i32, i32) {
    %c0_i32 = arith.constant 0 : i32
    %c0_i32_0 = arith.constant 0 : i32
    return %arg0, %c0_i32 : i32, i32
  }
  func.func @transform_2(%arg0: i32) -> (i32, i32, i32) {
    %c0_i32 = arith.constant 0 : i32
    %c0_i32_0 = arith.constant 0 : i32
    %c0_i32_1 = arith.constant 0 : i32
    return %arg0, %c0_i32, %c0_i32_0 : i32, i32, i32
  }
}

</mosaic_0001>

<bundles_post_ra>
// kernel: tpu_custom_call.1
= control target key start
LH: loop header
LB: loop body
LE: loop exit
PB: predicated region body
PF: predicated region fallthrough
CT: control target
= control target key end

     0   :  { %7 = vsyncpa [#allocation3], 0  ;;  %s820_s0 = inlined_call_operand.vmem [shape: f32[256,8], index: 0, kind: input, shape index: {}]   ;;  %s821_s1 = inlined_call_operand.vmem [shape: s32[256,1], index: 1, kind: input, shape index: {}]   ;;  %s822_s2 = inlined_call_operand.hbm [shape: f32[4,8,128], index: 2, kind: output, shape index: {}]  }
   0x1   :  { %9 = vsyncpa [#allocation3 + $0x1], 0  ;;  %s665_s9 = smov 0   ;;  %s667_s10 = smov 0  }
   0x2   :  { %s669_s11 = smov 0   ;;  %s671_s12 = smov 0  }
   0x3 LB: > { %s686_s13 = sadd.s32 4294967295, %s647_s12   ;;  %s494_s14 = sadd.s32 4294967294, %s647_s12   ;;  %s647_s12 = sphi %s671_s12, %s828_s12   ;;  %s643_s11 = sphi %s669_s11, %s827_s11   ;;  %s639_s10 = sphi %s667_s10, %s826_s10   ;;  %s635_s9 = sphi %s665_s9, %s825_s9  }
   0x4   : > { %s690_s15 = sadd.s32 1, %s647_s12   ;;  %s74_s16 = sadd.s32 1, %s643_s11 }
   0x5   : > { %s71_s17 = ssub.s32 %s647_s12, %s690_s15  ;;  %p84_p0 = scmp.ne.s32.totalorder %s643_s11, %s639_s10 }
   0x6   : > { %p72_p1 = scmp.eq.s32.totalorder %s71_s17, 0  ;;  %p85_p2 = scmp.eq.s32.totalorder %s686_s13, 3 }
   0x7   : > { %p90_p3 = scmp.ne.s32.totalorder %s639_s10, %s635_s9  ;;  %p91_p4 = scmp.eq.s32.totalorder %s494_s14, 3 }
   0x8   : > { %s701_s18 = scalar_select %p72_p1, %s643_s11, %s74_s16  }
   0x9   : > { %p703_p5 = por %p85_p2, %p84_p0  ;;  %p707_p6 = por %p91_p4, %p90_p3 }
   0xa   : > { %p497_p7 = scmp.ge.s32.totalorder %s647_s12, 1  ;;  %p127_p8 = scmp.lt.s32.totalorder %s647_s12, 5 }
   0xc   : > { %p128_p9 = pnand %p497_p7, %p127_p8 }
   0xd   : > { %s714_s21 = sshll.u32 (!%p128_p9), %s686_s13, 3  ;;  %s503_s30 = sshll.u32 (!%p128_p9), %s686_s13, 6 }
   0xe   : > { %131 = sbr.rel (%p128_p9) target bundleno = 520 (0x208), region = 28  ;;  %p155_p10 = scmp.lt.s32.totalorder (!%p128_p9), %s714_s21, 31 }
   0xf   : > { %s151_s3 = sand.u32 (!%p128_p9), 1, %s639_s10   ;;  %s418_s7 = scalar_lea.hbm (!%p128_p9), %s822_s2, %s714_s21 }
  0x10   : > { %s498_s4 = sshll.u32 (!%p128_p9), %s151_s3, 3  ;;  %s422_s14 = sshll.u32 (!%p128_p9), %s418_s7, 4  ;;  %s423_s14 = int_to_ptr.hbm [resolvable:$true] %s422_s14 }
  0x11   : > { %s153_s8 = scalar_lea.vmem (!%p128_p9), [#allocation2], %s498_s4  ;;  %s408_s17 = scalar_lea.sflag (!%p128_p9), [#allocation3], %s151_s3 }
  0x12   : > { %s420_s13 = sshll.u32 (!%p128_p9), %s153_s8, 4  ;;  %s421_s13 = int_to_ptr.vmem [resolvable:$true] %s420_s13 }
  0x13   : > { %v649_v0 = vmov 0   ;;  %s718_s22 = scalar_select %p155_p10, %s714_s21, 31  ;;  %vm182_vm0 = vcmask 64512   ;;  %v271_v33 = vlaneseq  ;;  %vm380_vm11 = vcmask 7168  }
  0x14   : > { %550 = vset.pattern.permute.xlu2 %v649_v0  ;;  %551 = vset.pattern.permute.xlu0 %v649_v0  ;;  %s605_s21 = scalar_lea.hbm %s822_s2, 32 }
  0x15   : > { %552 = vset.pattern.permute.xlu1 %v649_v0  ;;  %s500_s23 = sshll.u32 %s718_s22, 3  ;;  %v749_v38 = vand.u32 127, %v271_v33  ;;  %s599_s22 = sshra.s32 %s423_s14, 4  ;;  %s600_s22 = int_to_ptr.hbm [resolvable:$true] %s599_s22 }
  0x16   : > { %s158_s26 = scalar_lea.vmem %s820_s0, %s500_s23  ;;  %s164_s29 = scalar_lea.vmem %s821_s1, %s500_s23 }
  0x17   : > { %v724_v1 = vld [vmem:[%s158_s26 + $0x20] sm:$0xff]  ;;  %v168_v2 = vld [vmem:[%s158_s26 + $0x10] sm:$0xff]  ;;  %v171_v7 = vld [vmem:[%s158_s26 + $0x28] sm:$0xff]  ;;  %s601_s23 = scalar_lea.hbm %s600_s22, 8  ;;  %p606_p0 = scmp.lt.s32.totalorder %s600_s22, %s822_s2 }
  0x18   : > { %v166_v3 = vld [vmem:[%s158_s26] sm:$0xff]  ;;  %v195_v4 = vsel %vm182_vm0, %v724_v1, -inf  ;;  %v189_v5 = vsel %vm182_vm0, %v168_v2, -inf  ;;  %v169_v8 = vld [vmem:[%s158_s26 + $0x18] sm:$0xff]  ;;  %v167_v9 = vld [vmem:[%s158_s26 + $0x8] sm:$0xff]  ;;  %v198_v10 = vsel %vm182_vm0, %v171_v7, -inf  ;;  %p602_p11 = scmp.ne.s32.totalorder %s600_s22, %s601_s23  ;;  %p607_p1 = scmp.lt.s32.totalorder %s605_s21, %s601_s23 }
  0x19   : > { %v183_v6 = vsel %vm182_vm0, %v166_v3, -inf  ;;  %196 = vmax.xlane.f32.xlu2 %v195_v4  ;;  %190 = vmax.xlane.f32.xlu1 %v189_v5  ;;  %v192_v11 = vsel %vm182_vm0, %v169_v8, -inf  ;;  %v186_v12 = vsel %vm182_vm0, %v167_v9, -inf  ;;  %v733_v13 = vld [vmem:[%s158_s26 + $0x38] sm:$0xff]  ;;  %v172_v14 = vld [vmem:[%s158_s26 + $0x30] sm:$0xff]  ;;  %v174_v17 = vld [vmem:[%s164_s29] sm:$0xff] }
  0x1a   : > { %184 = vmax.xlane.f32.xlu0 %v183_v6  ;;  %v204_v15 = vsel %vm182_vm0, %v733_v13, -inf  ;;  %v201_v16 = vsel %vm182_vm0, %v172_v14, -inf  ;;  %v175_v18 = vld [vmem:[%s164_s29 + $0x8] sm:$0xff]  ;;  %v177_v19 = vld [vmem:[%s164_s29 + $0x18] sm:$0xff]  ;;  %v176_v20 = vld [vmem:[%s164_s29 + $0x10] sm:$0xff]  ;;  %p603_p12 = pnand %p602_p11, %p703_p5  ;;  %p608_p2 = por %p607_p1, %p606_p0 }
  0x1b   : > { %v178_v21 = vld [vmem:[%s164_s29 + $0x20] sm:$0xff]  ;;  %v179_v22 = vld [vmem:[%s164_s29 + $0x28] sm:$0xff]  ;;  %v180_v23 = vld [vmem:[%s164_s29 + $0x30] sm:$0xff] }
  0x1c   : > { %v181_v24 = vld [vmem:[%s164_s29 + $0x38] sm:$0xff]  ;;  %p604_p13 = pneg %p603_p12 }
  0x1e   : > { %p609_p3 = pnand %p608_p2, %p604_p13 }
  0x21   : > { %199 = vmax.xlane.f32.xlu2 %v198_v10  ;;  %193 = vmax.xlane.f32.xlu1 %v192_v11 }
  0x22   : > { %187 = vmax.xlane.f32.xlu0 %v186_v12 }
  0x29   : > { %205 = vmax.xlane.f32.xlu1 %v204_v15 }
  0x2a   : > { %202 = vmax.xlane.f32.xlu0 %v201_v16 }
  0x39   : > { %274 = vperm.xlu2 %550, %v174_v17  }
  0x3e   : > { %277 = vperm.xlu0 %551, %v175_v18  }
  0x41   : > { %283 = vperm.xlu2 %550, %v177_v19  }
  0x42   : > { %280 = vperm.xlu1 %552, %v176_v20  }
  0x49   : > { %286 = vperm.xlu2 %550, %v178_v21  }
  0x4a   : > { %289 = vperm.xlu1 %552, %v179_v22  }
  0x51   : > { %292 = vperm.xlu2 %550, %v180_v23  }
  0x52   : > { %295 = vperm.xlu1 %552, %v181_v24  }
  0x8c   : > { %v197_v25 = vpop.xlane.xlu2 %196  ;;  %v191_v26 = vpop.xlane.xlu1 %190 }
  0x8d   : > { %v741_v27 = vsub.f32 %v168_v2, %v191_v26  ;;  %v185_v28 = vpop.xlane.xlu0 %184  ;;  %v211_v2 = vsub.f32 %v724_v1, %v197_v25 }
  0x8e   : > { %v207_v41 = vsub.f32 %v166_v3, %v185_v28 }
  0x8f   : > { %v219_v29 = vmul.f32 1.442695, %v741_v27 }
  0x90   : > { %v215_v61 = vmul.f32 1.442695, %v207_v41 }
  0x91   : > { %553 = vpow2.f32 %v219_v29 }
  0x94   : > { %v200_v30 = vpop.xlane.xlu2 %199  ;;  %v194_v39 = vpop.xlane.xlu1 %193 }
  0x95   : > { %v744_v31 = vsub.f32 %v171_v7, %v200_v30  ;;  %v188_v32 = vpop.xlane.xlu0 %187  ;;  %v210_v43 = vsub.f32 %v169_v8, %v194_v39  ;;  %v223_v7 = vmul.f32 1.442695, %v211_v2  ;;  %v355_v39 = vstv %s503_s30 }
  0x96   : > { %v208_v34 = vsub.f32 %v167_v9, %v188_v32 }
  0x97   : > { %v225_v35 = vmul.f32 1.442695, %v744_v31  ;;  %v554_v36 = vpop.eup %553  ;;  %v221_v51 = vmul.f32 1.442695, %v210_v43 }
  0x98   : > { %v237_v37 = vsel %vm182_vm0, %v554_v36, 0.0  ;;  %v217_v40 = vmul.f32 1.442695, %v208_v34 }
  0x99   : > { %555 = vpow2.f32 %v225_v35  ;;  %238 = vadd.xlane.f32.xlu1 %v237_v37  ;;  %v346_v35 = vshrl.u32 %v271_v33, 7 }
  0x9a   : > { %557 = vpow2.f32 %v217_v40 }
  0x9b   : > { %v349_v33 = vadd.s32 24, %v346_v35 }
  0x9c   : > { %v275_v42 = vpop.permute.xlu2 %274  ;;  %v206_v58 = vpop.xlane.xlu1 %205 }
  0x9d   : > { %vm297_vm1 = vcmp.eq.s32.totalorder %v749_v38, %v275_v42  ;;  %v203_v44 = vpop.xlane.xlu0 %202  ;;  %v214_v12 = vsub.f32 %v733_v13, %v206_v58  ;;  %v359_v58 = vadd.s32 %v355_v39, %v349_v33 }
  0x9e   : > { %v213_v45 = vsub.f32 %v172_v14, %v203_v44  ;;  %v305_v46 = vsel %vm297_vm1, %v207_v41, 0.0  ;;  %v356_v41 = vadd.s32 %v355_v39, %v346_v35 }
  0x9f   : > { %v556_v47 = vpop.eup %555  ;;  %v313_v48 = vsel %vm182_vm0, %v305_v46, 0.0  ;;  %v229_v17 = vmul.f32 1.442695, %v214_v12  ;;  %vm367_vm13 = vcmp.lt.s32.totalorder %v359_v58, 200 }
  0xa0   : > { %v227_v49 = vmul.f32 1.442695, %v213_v45  ;;  %314 = vadd.xlane.f32.xlu2 %v313_v48  ;;  %v246_v50 = vsel %vm182_vm0, %v556_v47, 0.0  ;;  %v558_v52 = vpop.eup %557  ;;  %vm364_vm9 = vcmp.lt.s32.totalorder %v356_v41, 200 }
  0xa1   : > { %247 = vadd.xlane.f32.xlu1 %v246_v50  ;;  %v234_v54 = vsel %vm182_vm0, %v558_v52, 0.0 }
  0xa2   : > { %559 = vpow2.f32 %v227_v49 }
  0xa3   : > { %561 = vpow2.f32 %v221_v51 }
  0xa4   : > { %v284_v53 = vpop.permute.xlu2 %283  ;;  %563 = vpow2.f32 %v215_v61 }
  0xa5   : > { %vm300_vm2 = vcmp.eq.s32.totalorder %v749_v38, %v284_v53  ;;  %565 = vpow2.f32 %v223_v7 }
  0xa6   : > { %v308_v62 = vsel %vm300_vm2, %v210_v43, 0.0  ;;  %567 = vpow2.f32 %v229_v17  ;;  %v348_v43 = vadd.s32 16, %v346_v35 }
  0xa7   : > { %v322_v0 = vsel %vm182_vm0, %v308_v62, 0.0 }
  0xa8   : > { %v560_v55 = vpop.eup %559  ;;  %235 = vadd.xlane.f32.xlu2 %v234_v54  ;;  %v358_v52 = vadd.s32 %v355_v39, %v348_v43  ;;  %v350_v54 = vadd.s32 32, %v346_v35 }
  0xa9   : > { %v249_v56 = vsel %vm182_vm0, %v560_v55, 0.0  ;;  %v562_v57 = vpop.eup %561 }
  0xaa   : > { %250 = vadd.xlane.f32.xlu1 %v249_v56  ;;  %v240_v60 = vsel %vm182_vm0, %v562_v57, 0.0  ;;  %v564_v11 = vpop.eup %563  ;;  %vm366_vm12 = vcmp.lt.s32.totalorder %v358_v52, 200  ;;  %v360_v62 = vadd.s32 %v355_v39, %v350_v54 }
  0xab   : > { %v231_v14 = vsel %vm182_vm0, %v564_v11, 0.0  ;;  %v566_v19 = vpop.eup %565  ;;  %v353_v11 = vadd.s32 56, %v346_v35 }
  0xac   : > { %v287_v59 = vpop.permute.xlu2 %286  ;;  %v243_v20 = vsel %vm182_vm0, %v566_v19, 0.0  ;;  %v568_v23 = vpop.eup %567  ;;  %vm368_vm14 = vcmp.lt.s32.totalorder %v360_v62, 200 }
  0xad   : > { %vm301_vm6 = vcmp.eq.s32.totalorder %v749_v38, %v287_v59  ;;  %v252_v24 = vsel %vm182_vm0, %v568_v23, 0.0 }
  0xae   : > { %v309_v16 = vsel %vm301_vm6, %v211_v2, 0.0 }
  0xaf   : > { %v325_v18 = vsel %vm182_vm0, %v309_v16, 0.0 }
  0xb0   : > { %v278_v63 = vpop.permute.xlu0 %277  ;;  %241 = vadd.xlane.f32.xlu2 %v240_v60 }
  0xb1   : > { %vm298_vm3 = vcmp.eq.s32.totalorder %v749_v38, %v278_v63 }
  0xb2   : > { %323 = vadd.xlane.f32.xlu1 %v322_v0  ;;  %v306_v3 = vsel %vm298_vm3, %v208_v34, 0.0  ;;  %v352_v0 = vadd.s32 48, %v346_v35 }
  0xb3   : > { %v316_v4 = vsel %vm182_vm0, %v306_v3, 0.0 }
  0xb4   : > { %317 = vadd.xlane.f32.xlu0 %v316_v4  ;;  %v293_v5 = vpop.permute.xlu2 %292  ;;  %v281_v6 = vpop.permute.xlu1 %280 }
  0xb5   : > { %vm303_vm4 = vcmp.eq.s32.totalorder %v749_v38, %v293_v5  ;;  %vm299_vm5 = vcmp.eq.s32.totalorder %v749_v38, %v281_v6  ;;  %v351_v6 = vadd.s32 40, %v346_v35 }
  0xb6   : > { %v307_v8 = vsel %vm299_vm5, %v741_v27, 0.0  ;;  %v311_v9 = vsel %vm303_vm4, %v213_v45, 0.0 }
  0xb7   : > { %v319_v10 = vsel %vm182_vm0, %v307_v8, 0.0  ;;  %v331_v1 = vsel %vm182_vm0, %v311_v9, 0.0  ;;  %v361_v17 = vadd.s32 %v355_v39, %v351_v6 }
  0xb8   : > { %320 = vadd.xlane.f32.xlu2 %v319_v10 }
  0xba   : > { %332 = vadd.xlane.f32.xlu1 %v331_v1 }
  0xbc   : > { %232 = vadd.xlane.f32.xlu0 %v231_v14  ;;  %v290_v15 = vpop.permute.xlu1 %289 }
  0xbd   : > { %vm302_vm8 = vcmp.eq.s32.totalorder %v749_v38, %v290_v15 }
  0xbe   : > { %v310_v25 = vsel %vm302_vm8, %v744_v31, 0.0 }
  0xbf   : > { %v328_v26 = vsel %vm182_vm0, %v310_v25, 0.0 }
  0xc0   : > { %326 = vadd.xlane.f32.xlu2 %v325_v18 }
  0xc4   : > { %244 = vadd.xlane.f32.xlu0 %v243_v20  ;;  %v296_v21 = vpop.permute.xlu1 %295 }
  0xc5   : > { %vm304_vm7 = vcmp.eq.s32.totalorder %v749_v38, %v296_v21  ;;  %v347_v38 = vadd.s32 8, %v346_v35 }
  0xc6   : > { %v312_v22 = vsel %vm304_vm7, %v214_v12, 0.0  ;;  %v362_v12 = vadd.s32 %v355_v39, %v352_v0 }
  0xc7   : > { %v334_v13 = vsel %vm182_vm0, %v312_v22, 0.0  ;;  %v357_v42 = vadd.s32 %v355_v39, %v347_v38  ;;  %v363_v22 = vadd.s32 %v355_v39, %v353_v11  ;;  %vm369_vm0 = vcmp.lt.s32.totalorder %v361_v17, 200 }
  0xc8   : > { %335 = vadd.xlane.f32.xlu2 %v334_v13  ;;  %vm370_vm15 = vcmp.lt.s32.totalorder %v362_v12, 200 }
  0xc9   : > { %vm365_vm10 = vcmp.lt.s32.totalorder %v357_v42, 200  ;;  %vm371_vm1 = vcmp.lt.s32.totalorder %v363_v22, 200 }
  0xcc   : > { %253 = vadd.xlane.f32.xlu0 %v252_v24 }
  0xd4   : > { %329 = vadd.xlane.f32.xlu0 %v328_v26 }
 0x10c   : > { %v239_v28 = vpop.xlane.xlu1 %238 }
 0x113   : > { %v315_v27 = vpop.xlane.xlu2 %314 }
 0x114   : > { %v248_v30 = vpop.xlane.xlu1 %247 }
 0x11b   : > { %v236_v29 = vpop.xlane.xlu2 %235 }
 0x11c   : > { %569 = vlog2.f32 %v236_v29 }
 0x11d   : > { %v251_v36 = vpop.xlane.xlu1 %250 }
 0x122   : > { %v570_v31 = vpop.eup %569 }
 0x123   : > { %v242_v34 = vpop.xlane.xlu2 %241  ;;  %v258_v45 = vmul.f32 0.6931472, %v570_v31 }
 0x125   : > { %v324_v51 = vpop.xlane.xlu1 %323 }
 0x127   : > { %v318_v32 = vpop.xlane.xlu0 %317 }
 0x128   : > { %v338_v49 = vsub.f32 %v258_v45, %v318_v32 }
 0x12a   : > { %v373_v59 = vsel %vm365_vm10, %v338_v49, 0.0 }
 0x12b   : > { %v321_v40 = vpop.xlane.xlu2 %320  ;;  %v382_v3 = vsel %vm380_vm11, %v373_v59, 0.0 }
 0x12d   : > { %v333_v16 = vpop.xlane.xlu1 %332 }
 0x12f   : > { %v233_v37 = vpop.xlane.xlu0 %232 }
 0x130   : > { %571 = vlog2.f32 %v233_v37 }
 0x131   : > { %573 = vlog2.f32 %v239_v28 }
 0x132   : > { %575 = vlog2.f32 %v242_v34 }
 0x133   : > { %v327_v2 = vpop.xlane.xlu2 %326 }
 0x136   : > { %v572_v44 = vpop.eup %571 }
 0x137   : > { %v574_v46 = vpop.eup %573  ;;  %v256_v47 = vmul.f32 0.6931472, %v572_v44  ;;  %v245_v48 = vpop.xlane.xlu0 %244 }
 0x138   : > { %577 = vlog2.f32 %v245_v48  ;;  %v576_v50 = vpop.eup %575  ;;  %v260_v55 = vmul.f32 0.6931472, %v574_v46 }
 0x139   : > { %v337_v53 = vsub.f32 %v256_v47, %v315_v27  ;;  %579 = vlog2.f32 %v251_v36  ;;  %v262_v57 = vmul.f32 0.6931472, %v576_v50 }
 0x13a   : > { %v339_v60 = vsub.f32 %v260_v55, %v321_v40  ;;  %581 = vlog2.f32 %v248_v30 }
 0x13b   : > { %v372_v56 = vsel %vm364_vm9, %v337_v53, 0.0  ;;  %v340_v7 = vsub.f32 %v262_v57, %v324_v51  ;;  %v336_v29 = vpop.xlane.xlu2 %335 }
 0x13c   : > { %v381_v61 = vsel %vm380_vm11, %v372_v56, 0.0  ;;  %v374_v8 = vsel %vm366_vm12, %v339_v60, 0.0 }
 0x13d   : > { %v383_v9 = vadd.f32 %v382_v3, %v381_v61  ;;  %v384_v15 = vsel %vm380_vm11, %v374_v8, 0.0  ;;  %v375_v19 = vsel %vm367_vm13, %v340_v7, 0.0 }
 0x13e   : > { %v578_v63 = vpop.eup %577  ;;  %v386_v25 = vsel %vm380_vm11, %v375_v19, 0.0 }
 0x13f   : > { %v264_v4 = vmul.f32 0.6931472, %v578_v63  ;;  %v254_v5 = vpop.xlane.xlu0 %253  ;;  %v580_v10 = vpop.eup %579  ;;  %v385_v20 = vadd.f32 %v384_v15, %v383_v9 }
 0x140   : > { %583 = vlog2.f32 %v254_v5  ;;  %v582_v14 = vpop.eup %581  ;;  %v268_v18 = vmul.f32 0.6931472, %v580_v10 }
 0x141   : > { %v341_v1 = vsub.f32 %v264_v4, %v327_v2  ;;  %v266_v23 = vmul.f32 0.6931472, %v582_v14  ;;  %v387_v30 = vadd.f32 %v386_v25, %v385_v20 }
 0x142   : > { %v343_v24 = vsub.f32 %v268_v18, %v333_v16 }
 0x143   : > { %v376_v21 = vsel %vm368_vm14, %v341_v1, 0.0 }
 0x144   : > { %v388_v26 = vsel %vm380_vm11, %v376_v21, 0.0  ;;  %v378_v35 = vsel %vm370_vm15, %v343_v24, 0.0 }
 0x145   : > { %v389_v36 = vadd.f32 %v388_v26, %v387_v30  ;;  %v392_v40 = vsel %vm380_vm11, %v378_v35, 0.0 }
 0x146   : > { %v584_v13 = vpop.eup %583 }
 0x147   : > { %v270_v27 = vmul.f32 0.6931472, %v584_v13  ;;  %v330_v28 = vpop.xlane.xlu0 %329 }
 0x148   : > { %v342_v32 = vsub.f32 %v266_v23, %v330_v28 }
 0x149   : > { %v344_v34 = vsub.f32 %v270_v27, %v336_v29 }
 0x14a   : > { %v377_v37 = vsel %vm369_vm0, %v342_v32, 0.0 }
 0x14b   : > { %v390_v38 = vsel %vm380_vm11, %v377_v37, 0.0  ;;  %v379_v31 = vsel %vm371_vm1, %v344_v34, 0.0 }
 0x14c   : > { %v391_v39 = vadd.f32 %v390_v38, %v389_v36  ;;  %v394_v42 = vsel %vm380_vm11, %v379_v31, 0.0 }
 0x14e   : > { %v393_v41 = vadd.f32 %v392_v40, %v391_v39 }
 0x150   : > { %v395_v43 = vadd.f32 %v394_v42, %v393_v41 }
 0x152   : > { %396 = vadd.xlane.f32.xlu0 %v395_v43 }
 0x1c5   : > { %v397_v44 = vpop.xlane.xlu0 %396 }
 0x1c6   : > { %v398_v45 = vrot.slane %v397_v44, 4 }
 0x1c8   : > { %v399_v46 = vadd.f32 %v398_v45, %v397_v44 }
 0x1ca   : > { %v400_v47 = vrot.slane %v399_v46, 2 }
 0x1cc   : > { %v401_v48 = vadd.f32 %v400_v47, %v399_v46 }
 0x1ce   : > { %v402_v33 = vrot.slane %v401_v48, 1 }
 0x1d0   : > { %v403_v49 = vadd.f32 %v402_v33, %v401_v48 }
 0x1d2   : > { %508 = vpush %v403_v49 }
 0x203   : > { %s509_s16 = spop %508 }
 0x204   : > { %v405_v50 = vstv %s509_s16 }
 0x205   : > { %406 = vst [vmem:[%s153_s8] sm:$0xff] %v405_v50 }
 0x206   : > { %612 = shalt.err (!%p609_p3)
}
 0x207   : > { %510 = dma.vmem_to_hbm [thread:$0]  (%p703_p5), %s421_s13, 128, %s423_s14, %s408_s17  }
 0x208 PF: > { %p516_p4 = scmp.ge.s32.totalorder %s647_s12, 2  ;;  %s434_s28 = sand.u32 1, %s635_s9  }
 0x209   : > { %s435_s29 = scalar_lea.sflag [#allocation3], %s434_s28 }
 0x20a   : > { %p513_p7 = pnand %p516_p4, %p707_p6 }
 0x20c   : > { %p514_p8 = pneg %p513_p7 }
 0x20e   : > { %630 = dma.done.wait (%p514_p8), %s435_s29, 128  }
 0x20f   : > { %632 = vsyncadd (%p514_p8), %s435_s29, 4294967168  ;;  %p12_p9 = scmp.ge.s32.totalorder %s690_s15, 6   ;;  %s825_s9 = smov %s639_s10 }
 0x210   : > { %s826_s10 = smov %s643_s11  ;;  %s827_s11 = smov %s701_s18 }
 0x211   : > { %s828_s12 = smov %s690_s15  ;;  %14 = sbr.rel (!%p12_p9) target bundleno = 3 (0x3), region = 66 }
 0x216   :  { %441 = vsyncpa [#allocation3], 1 }
 0x217   :  { %443 = vsyncpa [#allocation3 + $0x1], 1 }

</bundles_post_ra>
